<compile_context>
chip_gen: v5e
topology: v5e:2x2
jax: 0.10.0
libtpu: 0.0.40
codegen_flags: <defaults>
</compile_context>

<pallas_src>
import functools

import jax
import jax.numpy as jnp
from jax.experimental import pallas as pl
from jax.experimental.pallas import tpu as pltpu


# --------------------------------------------------------------------------
# One-time capability probe (narrow; no bare except around the kernel call).
def _probe_buffered_support():
    if not hasattr(pl, "Buffered"):
        return False
    try:
        pl.BlockSpec((8, 128), lambda i: (0, 0), pipeline_mode=pl.Buffered(1))
        return True
    except TypeError:
        return False


_HAS_BUFFERED = _probe_buffered_support()

_LANES = 128
_ROW_TILE_QUANTUM = 16                      # multiple of 8; enables the 2-way row split
_MAX_ROW_TILE = 4096
_VMEM_PLAN_BYTES = 48 * 1024 * 1024         # planning budget (v7x has 64 MiB / TC)
_VMEM_HEADROOM = 4 * 1024 * 1024            # Mosaic internal scratch / semaphores
_VMEM_LIMIT_CAP = 56 * 1024 * 1024
_SINGLE_BUFFER_WEIGHTS_ABOVE = 16 * 1024 * 1024


def _round_up(x, m):
    return (x + m - 1) // m * m


# --------------------------------------------------------------------------
# Kernel: one row tile of  o = x + silu(silu(x @ W1t + b1) @ W2t + b2)
def _residual_kernel(x_ref, w1_ref, b1_ref, w2_ref, b2_ref, o_ref):
    w1 = w1_ref[...]                        # resident weights, native operand dtype
    w2 = w2_ref[...]
    b1 = b1_ref[...]                        # f32 biases
    b2 = b2_ref[...]

    rows = x_ref.shape[0]
    half = rows // 2
    # Two independent halves: the MXU matmul of one overlaps the VPU/EUP SiLU
    # of the other (LLO scheduler fills the free slots).
    for lo, hi in ((0, half), (half, rows)):
        x = x_ref[lo:hi, :]
        h = jnp.dot(x, w1, preferred_element_type=jnp.float32) + b1
        h = h * jax.nn.sigmoid(h)                                   # SiLU in f32
        h = jnp.dot(h.astype(w2.dtype), w2,
                    preferred_element_type=jnp.float32) + b2
        h = h * jax.nn.sigmoid(h)
        o_ref[lo:hi, :] = (x.astype(jnp.float32) + h).astype(o_ref.dtype)


# --------------------------------------------------------------------------
@functools.partial(jax.jit, static_argnames=("compute_dtype",))
def residual_layer(x, w1, b1, w2, b2, *, compute_dtype=None):
    """ResidualLayer forward: x + silu(lin2(silu(lin1(x)))).

    x: [N, H]; w1, w2: [H, H] (PyTorch [out, in] layout); b1, b2: [H].
    compute_dtype: optional matmul operand dtype (e.g. jnp.bfloat16).  MXU
    accumulation, SiLU and the residual are f32; the result is returned in x's
    original dtype.
    """
    orig_dtype = x.dtype
    n, h = x.shape

    cdt = jnp.dtype(compute_dtype) if compute_dtype is not None else jnp.dtype(orig_dtype)
    x = x.astype(cdt)
    w1t = jnp.asarray(w1).astype(cdt).T     # [in, out] -> kernel does x @ Wt + b
    w2t = jnp.asarray(w2).astype(cdt).T
    b1 = jnp.asarray(b1).astype(jnp.float32)
    b2 = jnp.asarray(b2).astype(jnp.float32)

    # --- lane layout -------------------------------------------------------
    # Pack `pack` logical rows per 128-lane row (block-diagonal weights) when
    # H divides 128; otherwise fall back to lane padding.  H % 128 == 0 needs
    # neither (zero wrapper pad/slice passes in the common case).
    pack = _LANES // h if (h < _LANES and _LANES % h == 0) else 1
    hp = _round_up(h * pack, _LANES)
    lane_pad = hp - h * pack                # 0 when packed or H % 128 == 0

    if pack > 1:
        eye = jnp.eye(pack, dtype=cdt)
        w1t = jnp.kron(eye, w1t)            # blockdiag(Wt, ..., Wt)
        w2t = jnp.kron(eye, w2t)
        b1 = jnp.tile(b1, pack)
        b2 = jnp.tile(b2, pack)
    if lane_pad:
        # Zero padding is exact: padded x columns, weight rows/cols and biases
        # are all zero, so padded output lanes stay zero and are sliced away.
        w1t = jnp.pad(w1t, ((0, lane_pad), (0, lane_pad)))
        w2t = jnp.pad(w2t, ((0, lane_pad), (0, lane_pad)))
        b1 = jnp.pad(b1, (0, lane_pad))
        b2 = jnp.pad(b2, (0, lane_pad))
    b1 = b1.reshape(1, hp)
    b2 = b2.reshape(1, hp)

    if pack > 1:
        n_rows = -(-n // pack)
        if n_rows * pack != n:              # pad only the ragged tail rows
            x = jnp.pad(x, ((0, n_rows * pack - n), (0, 0)))
        xk = x.reshape(n_rows, pack * h)    # contiguous reshape (free)
    else:
        n_rows = n
        xk = jnp.pad(x, ((0, 0), (0, lane_pad))) if lane_pad else x

    # --- tiling / VMEM budget ----------------------------------------------
    x_item = cdt.itemsize
    o_item = jnp.dtype(orig_dtype).itemsize
    w_bytes_one = 2 * hp * hp * x_item + 2 * hp * 4          # W1t + W2t + f32 biases
    single_buffer_weights = _HAS_BUFFERED and (2 * w_bytes_one > _SINGLE_BUFFER_WEIGHTS_ABOVE)
    weight_bufs = 1 if single_buffer_weights else 2
    weights_bytes = weight_bufs * w_bytes_one
    # TODO(synk): add a K-tiled grid axis ("arbitrary") + f32 accumulator for
    # hidden dims whose resident weights alone overflow the VMEM budget.

    io_bytes_per_row = 2 * hp * (x_item + o_item)            # double-buffered x + out
    io_budget = _VMEM_PLAN_BYTES - _VMEM_HEADROOM - weights_bytes
    tile = max(_ROW_TILE_QUANTUM, min(_MAX_ROW_TILE, io_budget // io_bytes_per_row))
    tile = (tile // _ROW_TILE_QUANTUM) * _ROW_TILE_QUANTUM
    if n_rows >= 2 * _ROW_TILE_QUANTUM:
        # >= 2 grid steps so v7x's two TensorCores both get row tiles.
        tile = min(tile, _round_up(-(-n_rows // 2), _ROW_TILE_QUANTUM))
    tile = min(tile, _round_up(n_rows, _ROW_TILE_QUANTUM))
    tile = max(tile, _ROW_TILE_QUANTUM)

    num_tiles = pl.cdiv(n_rows, tile)       # ragged tail -> masked partial last block
    vmem_limit = int(min(_VMEM_LIMIT_CAP,
                         max(8 * 1024 * 1024,
                             weights_bytes + tile * io_bytes_per_row + _VMEM_HEADROOM)))

    if single_buffer_weights:
        def weight_spec(shape):
            return pl.BlockSpec(shape, lambda i: (0, 0), pipeline_mode=pl.Buffered(1))
    else:
        def weight_spec(shape):
            return pl.BlockSpec(shape, lambda i: (0, 0))

    out = pl.pallas_call(
        _residual_kernel,
        out_shape=jax.ShapeDtypeStruct((n_rows, hp), orig_dtype),
        grid=(num_tiles,),
        in_specs=[
            pl.BlockSpec((tile, hp), lambda i: (i, 0)),      # x row tile (streamed)
            weight_spec((hp, hp)),                           # W1^T (resident)
            weight_spec((1, hp)),                            # b1   (f32)
            weight_spec((hp, hp)),                           # W2^T (resident)
            weight_spec((1, hp)),                            # b2   (f32)
        ],
        out_specs=pl.BlockSpec((tile, hp), lambda i: (i, 0)),
        compiler_params=pltpu.CompilerParams(
            dimension_semantics=("parallel",),               # megacore shards row tiles
            vmem_limit_bytes=vmem_limit,
        ),
    )(xk, w1t, b1, w2t, b2)

    if pack > 1:
        out = out.reshape(n_rows * pack, h)
        if n_rows * pack != n:
            out = out[:n]
    elif lane_pad:
        out = out[:, :h]
    return out


# --------------------------------------------------------------------------
# Reference + demo
def _silu(v):
    return v * jax.nn.sigmoid(v)


def _reference(x, w1, b1, w2, b2):
    hi = jax.lax.Precision.HIGHEST
    h = _silu(jnp.dot(x, w1.T, precision=hi) + b1)
    h = _silu(jnp.dot(h, w2.T, precision=hi) + b2)
    return x + h


def _glorot_orthogonal_like(key, shape, scale=2.0):
    # Deterministic stand-in for glorot_orthogonal: orthogonalize a random
    # matrix, rescale so Var(W) = scale / (fan_in + fan_out).
    fan_out, fan_in = shape
    w = jax.random.normal(key, shape, dtype=jnp.float32)
    q, _ = jnp.linalg.qr(w)
    q = q[:fan_out, :fan_in]
    var = jnp.var(q)
    return q * jnp.sqrt(scale / ((fan_in + fan_out) * var))


if __name__ == "__main__":
    key = jax.random.PRNGKey(0)
    kx, k1, k2 = jax.random.split(key, 3)

    # ---- small hidden dim (module default-ish): exercises row packing -------
    hidden, n = 32, 50                      # ragged N, H < 128 -> pack 4 rows/lane-row
    x = jax.random.normal(kx, (n, hidden), dtype=jnp.float32)
    w1 = _glorot_orthogonal_like(k1, (hidden, hidden), scale=2.0)
    b1 = jnp.zeros((hidden,), dtype=jnp.float32)
    w2 = _glorot_orthogonal_like(k2, (hidden, hidden), scale=2.0)
    b2 = jnp.zeros((hidden,), dtype=jnp.float32)

    ref = _reference(x, w1, b1, w2, b2)
    out = jax.block_until_ready(residual_layer(x, w1, b1, w2, b2))
    assert out.shape == x.shape and out.dtype == x.dtype
    assert jnp.allclose(out, ref, atol=1e-5, rtol=1e-5), "mismatch (packed H=32)"

    # ---- H = 128: no padding/packing, multi-step grid + ragged tail ---------
    n2, h2 = 600, 128
    x2 = jax.random.normal(kx, (n2, h2), dtype=jnp.float32)
    w1b = _glorot_orthogonal_like(k1, (h2, h2), scale=2.0)
    w2b = _glorot_orthogonal_like(k2, (h2, h2), scale=2.0)
    b1b = jnp.zeros((h2,), dtype=jnp.float32)
    b2b = jnp.zeros((h2,), dtype=jnp.float32)

    ref2 = _reference(x2, w1b, b1b, w2b, b2b)
    out2 = jax.block_until_ready(residual_layer(x2, w1b, b1b, w2b, b2b))
    assert out2.shape == x2.shape and out2.dtype == x2.dtype
    assert jnp.allclose(out2, ref2, atol=1e-4, rtol=1e-4), "mismatch (H=128, tiled)"

    # ---- bf16 compute path: operands bf16, output returned in caller dtype --
    out_bf = jax.block_until_ready(
        residual_layer(x2, w1b, b1b, w2b, b2b, compute_dtype=jnp.bfloat16))
    assert out_bf.dtype == x2.dtype
    assert jnp.allclose(out_bf, ref2, atol=2e-1, rtol=5e-2), "mismatch (bf16 compute)"

    print("KERNEL_OK")
</pallas_src>

<mosaic_0001>
module attributes {stable_mosaic.version = 11 : i64} {
  func.func @_residual_kernel(%arg0: i32, %arg1: memref<16x128xf32, #tpu.memory_space<vmem>>, %arg2: memref<128x128xf32, #tpu.memory_space<vmem>>, %arg3: memref<1x128xf32, #tpu.memory_space<vmem>>, %arg4: memref<128x128xf32, #tpu.memory_space<vmem>>, %arg5: memref<1x128xf32, #tpu.memory_space<vmem>>, %arg6: memref<16x128xf32, #tpu.memory_space<vmem>>) attributes {dimension_semantics = [#tpu.dimension_semantics<parallel>], iteration_bounds = array<i64: 1>, scalar_prefetch = 0 : i64, scratch_operands = 0 : i64, tpu.core_type = #tpu.core_type<tc>, window_params = [{transform_indices = @transform_0, window_bounds = array<i64: 16, 128>}, {pipeline_mode = #tpu.pipeline_mode<synchronous>, transform_indices = @transform_1, window_bounds = array<i64: 128, 128>}, {pipeline_mode = #tpu.pipeline_mode<synchronous>, transform_indices = @transform_2, window_bounds = array<i64: 1, 128>}, {pipeline_mode = #tpu.pipeline_mode<synchronous>, transform_indices = @transform_3, window_bounds = array<i64: 128, 128>}, {pipeline_mode = #tpu.pipeline_mode<synchronous>, transform_indices = @transform_4, window_bounds = array<i64: 1, 128>}, {transform_indices = @transform_5, window_bounds = array<i64: 16, 128>}]} {
    %c0 = arith.constant 0 : index
    %c0_0 = arith.constant 0 : index
    %0 = vector.load %arg2[%c0, %c0_0] : memref<128x128xf32, #tpu.memory_space<vmem>>, vector<128x128xf32>
    %c0_1 = arith.constant 0 : index
    %c0_2 = arith.constant 0 : index
    %1 = vector.load %arg4[%c0_1, %c0_2] : memref<128x128xf32, #tpu.memory_space<vmem>>, vector<128x128xf32>
    %c0_3 = arith.constant 0 : index
    %c0_4 = arith.constant 0 : index
    %2 = vector.load %arg3[%c0_3, %c0_4] : memref<1x128xf32, #tpu.memory_space<vmem>>, vector<1x128xf32>
    %c0_5 = arith.constant 0 : index
    %c0_6 = arith.constant 0 : index
    %3 = vector.load %arg5[%c0_5, %c0_6] : memref<1x128xf32, #tpu.memory_space<vmem>>, vector<1x128xf32>
    %c0_7 = arith.constant 0 : index
    %c0_8 = arith.constant 0 : index
    %4 = vector.load %arg1[%c0_7, %c0_8] : memref<16x128xf32, #tpu.memory_space<vmem>>, vector<8x128xf32>
    %cst = arith.constant dense<0.000000e+00> : vector<8x128xf32>
    %5 = tpu.matmul %4, %0, %cst {dimension_numbers = #tpu.dot_dimension_numbers<[1], [0], [0], [1], [0, 0, 1, 1], [], []>} : vector<8x128xf32>, vector<128x128xf32>, vector<8x128xf32> -> vector<8x128xf32>
    %6 = vector.broadcast %2 : vector<1x128xf32> to vector<8x128xf32>
    %7 = arith.addf %5, %6 : vector<8x128xf32>
    %8 = arith.negf %7 : vector<8x128xf32>
    %9 = math.exp %8 : vector<8x128xf32>
    %cst_9 = arith.constant 1.000000e+00 : f32
    %10 = vector.broadcast %cst_9 : f32 to vector<8x128xf32>
    %11 = arith.addf %10, %9 : vector<8x128xf32>
    %12 = arith.divf %10, %11 : vector<8x128xf32>
    %13 = arith.mulf %7, %12 : vector<8x128xf32>
    %cst_10 = arith.constant dense<0.000000e+00> : vector<8x128xf32>
    %14 = tpu.matmul %13, %1, %cst_10 {dimension_numbers = #tpu.dot_dimension_numbers<[1], [0], [0], [1], [0, 0, 1, 1], [], []>} : vector<8x128xf32>, vector<128x128xf32>, vector<8x128xf32> -> vector<8x128xf32>
    %15 = vector.broadcast %3 : vector<1x128xf32> to vector<8x128xf32>
    %16 = arith.addf %14, %15 : vector<8x128xf32>
    %17 = arith.negf %16 : vector<8x128xf32>
    %18 = math.exp %17 : vector<8x128xf32>
    %cst_11 = arith.constant 1.000000e+00 : f32
    %19 = vector.broadcast %cst_11 : f32 to vector<8x128xf32>
    %20 = arith.addf %19, %18 : vector<8x128xf32>
    %21 = arith.divf %19, %20 : vector<8x128xf32>
    %22 = arith.mulf %16, %21 : vector<8x128xf32>
    %23 = arith.addf %4, %22 : vector<8x128xf32>
    %c0_12 = arith.constant 0 : index
    %c0_13 = arith.constant 0 : index
    %24 = vector.load %arg6[%c0_12, %c0_13] : memref<16x128xf32, #tpu.memory_space<vmem>>, vector<8x128xf32>
    tpu.vector_store %arg6[%c0_12, %c0_13], %23 {strides = array<i32>} : memref<16x128xf32, #tpu.memory_space<vmem>>, vector<8x128xf32>,
    %c8 = arith.constant 8 : index
    %c0_14 = arith.constant 0 : index
    %25 = vector.load %arg1[%c8, %c0_14] : memref<16x128xf32, #tpu.memory_space<vmem>>, vector<8x128xf32>
    %cst_15 = arith.constant dense<0.000000e+00> : vector<8x128xf32>
    %26 = tpu.matmul %25, %0, %cst_15 {dimension_numbers = #tpu.dot_dimension_numbers<[1], [0], [0], [1], [0, 0, 1, 1], [], []>} : vector<8x128xf32>, vector<128x128xf32>, vector<8x128xf32> -> vector<8x128xf32>
    %27 = vector.broadcast %2 : vector<1x128xf32> to vector<8x128xf32>
    %28 = arith.addf %26, %27 : vector<8x128xf32>
    %29 = arith.negf %28 : vector<8x128xf32>
    %30 = math.exp %29 : vector<8x128xf32>
    %cst_16 = arith.constant 1.000000e+00 : f32
    %31 = vector.broadcast %cst_16 : f32 to vector<8x128xf32>
    %32 = arith.addf %31, %30 : vector<8x128xf32>
    %33 = arith.divf %31, %32 : vector<8x128xf32>
    %34 = arith.mulf %28, %33 : vector<8x128xf32>
    %cst_17 = arith.constant dense<0.000000e+00> : vector<8x128xf32>
    %35 = tpu.matmul %34, %1, %cst_17 {dimension_numbers = #tpu.dot_dimension_numbers<[1], [0], [0], [1], [0, 0, 1, 1], [], []>} : vector<8x128xf32>, vector<128x128xf32>, vector<8x128xf32> -> vector<8x128xf32>
    %36 = vector.broadcast %3 : vector<1x128xf32> to vector<8x128xf32>
    %37 = arith.addf %35, %36 : vector<8x128xf32>
    %38 = arith.negf %37 : vector<8x128xf32>
    %39 = math.exp %38 : vector<8x128xf32>
    %cst_18 = arith.constant 1.000000e+00 : f32
    %40 = vector.broadcast %cst_18 : f32 to vector<8x128xf32>
    %41 = arith.addf %40, %39 : vector<8x128xf32>
    %42 = arith.divf %40, %41 : vector<8x128xf32>
    %43 = arith.mulf %37, %42 : vector<8x128xf32>
    %44 = arith.addf %25, %43 : vector<8x128xf32>
    %c8_19 = arith.constant 8 : index
    %c0_20 = arith.constant 0 : index
    %45 = vector.load %arg6[%c8_19, %c0_20] : memref<16x128xf32, #tpu.memory_space<vmem>>, vector<8x128xf32>
    tpu.vector_store %arg6[%c8_19, %c0_20], %44 {strides = array<i32>} : memref<16x128xf32, #tpu.memory_space<vmem>>, vector<8x128xf32>,
    return
  }
  func.func @transform_0(%arg0: i32) -> (i32, i32) {
    %c0_i32 = arith.constant 0 : i32
    %c0_i32_0 = arith.constant 0 : i32
    return %arg0, %c0_i32 : i32, i32
  }
  func.func @transform_1(%arg0: i32) -> (i32, i32) {
    %c0_i32 = arith.constant 0 : i32
    %c0_i32_0 = arith.constant 0 : i32
    %c0_i32_1 = arith.constant 0 : i32
    return %c0_i32, %c0_i32_0 : i32, i32
  }
  func.func @transform_2(%arg0: i32) -> (i32, i32) {
    %c0_i32 = arith.constant 0 : i32
    %c0_i32_0 = arith.constant 0 : i32
    %c0_i32_1 = arith.constant 0 : i32
    return %c0_i32, %c0_i32_0 : i32, i32
  }
  func.func @transform_3(%arg0: i32) -> (i32, i32) {
    %c0_i32 = arith.constant 0 : i32
    %c0_i32_0 = arith.constant 0 : i32
    %c0_i32_1 = arith.constant 0 : i32
    return %c0_i32, %c0_i32_0 : i32, i32
  }
  func.func @transform_4(%arg0: i32) -> (i32, i32) {
    %c0_i32 = arith.constant 0 : i32
    %c0_i32_0 = arith.constant 0 : i32
    %c0_i32_1 = arith.constant 0 : i32
    return %c0_i32, %c0_i32_0 : i32, i32
  }
  func.func @transform_5(%arg0: i32) -> (i32, i32) {
    %c0_i32 = arith.constant 0 : i32
    %c0_i32_0 = arith.constant 0 : i32
    return %arg0, %c0_i32 : i32, i32
  }
}

</mosaic_0001>

<bundles_post_ra>
// kernel: tile.13
= control target key start
LH: loop header
LB: loop body
LE: loop exit
PB: predicated region body
PF: predicated region fallthrough
CT: control target
= control target key end

     0   :  { %s22_s0 = inlined_call_operand.vmem [shape: f32[32], index: 0, kind: input, shape index: {}]   ;;  %s23_s1 = inlined_call_operand.vmem [shape: f32[4,32], index: 1, kind: output, shape index: {}]  }
   0x1   :  { %v4_v0 = vld [vmem:[%s22_s0] ss:$0 sm:$0xff] }
   0x2   :  { %5 = vst [vmem:[%s23_s1] sm:$0xf] %v4_v0 }

// kernel: tile.18
= control target key start
LH: loop header
LB: loop body
LE: loop exit
PB: predicated region body
PF: predicated region fallthrough
CT: control target
= control target key end

     0   :  { %s37_s8 = smov 32   ;;  %s38_s9 = smov 64   ;;  %vm7_vm0 = vcmask 261120   ;;  %vm13_vm1 = vcmask 1048320   ;;  %vm19_vm2 = vcmask 785920   ;;  %vm25_vm3 = vcmask 523520   ;;  %s55_s0 = inlined_call_operand.vmem [shape: f32[4,32], index: 0, kind: input, shape index: {}]   ;;  %s56_s1 = inlined_call_operand.vmem [shape: f32[1,128], index: 1, kind: output, shape index: {}]  }
   0x1   :  { %v4_v0 = vld [vmem:[%s55_s0] sm:$0xf]  ;;  %s36_s0 = smov 96  }
   0x2   :  { %5 = vst [vmem:[#allocation1] sm:$0xf] %v4_v0 }
   0x9   :  { %v10_v1 = vld [vmem:[#allocation1 + $0x3] sm:$0x1]   ;;  %v22_v2 = vld [vmem:[#allocation1 + $0x1] sm:$0x1]   ;;  %v16_v3 = vld [vmem:[#allocation1 + $0x2] sm:$0x1]  }
   0xa   :  { %11 = vrot.lane.b32.xlu0 %v10_v1, %s36_s0  ;;  %23 = vrot.lane.b32.xlu1 %v22_v2, %s37_s8  ;;  %v6_v4 = vld [vmem:[#allocation1] sm:$0x1]  }
   0xb   :  { %8 = vst.msk [vmem:[#allocation0] sm:$0x1] %vm7_vm0, %v6_v4  }
  0x12   :  { %17 = vrot.lane.b32.xlu0 %v16_v3, %s38_s9 }
  0x7c   :  { %v12_v5 = vpop.permute.xlu0 %11   ;;  %v24_v6 = vpop.permute.xlu1 %23  }
  0x7d   :  { %14 = vst.msk [vmem:[#allocation0] sm:$0x1] %vm13_vm1, %v12_v5  }
  0x84   :  { %v18_v7 = vpop.permute.xlu0 %17  }
  0x85   :  { %20 = vst.msk [vmem:[#allocation0] sm:$0x1] %vm19_vm2, %v18_v7  }
  0x86   :  { %26 = vst.msk [vmem:[#allocation0] sm:$0x1] %vm25_vm3, %v24_v6  }
  0x8d   :  { %v29_v8 = vld [vmem:[#allocation0] sm:$0x1] }
  0x8e   :  { %32 = vst [vmem:[%s56_s1] sm:$0x1] %v29_v8 }

// kernel: residual_layer.1
= control target key start
LH: loop header
LB: loop body
LE: loop exit
PB: predicated region body
PF: predicated region fallthrough
CT: control target
= control target key end

     0   :  { %s404_s1 = inlined_call_operand.vmem [shape: f32[128,128], index: 1, kind: input, shape index: {}]   ;;  %s405_s2 = inlined_call_operand.vmem [shape: f32[1,128], index: 2, kind: input, shape index: {}]   ;;  %s406_s0 = inlined_call_operand.vmem [shape: f32[13,128], index: 0, kind: input, shape index: {}]   ;;  %s407_s4 = inlined_call_operand.vmem [shape: f32[1,128], index: 4, kind: input, shape index: {}]   ;;  %s408_s3 = inlined_call_operand.vmem [shape: f32[128,128], index: 3, kind: input, shape index: {}]   ;;  %s409_s5 = inlined_call_operand.vmem [shape: f32[13,128], index: 5, kind: output, shape index: {}]  }
   0x1   :  { %v35_v0 = vld [vmem:[%s404_s1 + $0x78] sm:$0xff]  ;;  %v34_v1 = vld [vmem:[%s404_s1 + $0x70] sm:$0xff]  ;;  %v33_v2 = vld [vmem:[%s404_s1 + $0x68] sm:$0xff] }
   0x2   :  { %58 = vmatpush.msra.mxu0 %v35_v0  ;;  %144 = vmatpush.msra.mxu2 %v35_v0  ;;  %v32_v3 = vld [vmem:[%s404_s1 + $0x60] sm:$0xff]  ;;  %v31_v4 = vld [vmem:[%s404_s1 + $0x58] sm:$0xff]  ;;  %v30_v5 = vld [vmem:[%s404_s1 + $0x50] sm:$0xff] }
   0x3   :  { %v29_v6 = vld [vmem:[%s404_s1 + $0x48] sm:$0xff]  ;;  %v28_v7 = vld [vmem:[%s404_s1 + $0x40] sm:$0xff]  ;;  %v27_v8 = vld [vmem:[%s404_s1 + $0x38] sm:$0xff] }
   0x4   :  { %59 = vmatpush.msra.mxu0 %v34_v1  ;;  %145 = vmatpush.msra.mxu2 %v34_v1  ;;  %v26_v9 = vld [vmem:[%s404_s1 + $0x30] sm:$0xff]  ;;  %v25_v10 = vld [vmem:[%s404_s1 + $0x28] sm:$0xff]  ;;  %v24_v11 = vld [vmem:[%s404_s1 + $0x20] sm:$0xff] }
   0x5   :  { %v23_v12 = vld [vmem:[%s404_s1 + $0x18] sm:$0xff]  ;;  %v22_v13 = vld [vmem:[%s404_s1 + $0x10] sm:$0xff]  ;;  %v21_v14 = vld [vmem:[%s404_s1 + $0x8] sm:$0xff] }
   0x6   :  { %60 = vmatpush.msra.mxu0 %v33_v2  ;;  %146 = vmatpush.msra.mxu2 %v33_v2  ;;  %v20_v15 = vld [vmem:[%s404_s1] sm:$0xff]  ;;  %v338_v17 = vld [vmem:[%s406_s0 + $0x8] sm:$0xff]  ;;  %v51_v18 = vld [vmem:[%s408_s3 + $0x78] sm:$0xff] }
   0x7   :  { %v333_v16 = vld [vmem:[%s406_s0] sm:$0xff]  ;;  %101 = vmatpush.msra.mxu1 %v51_v18  ;;  %184 = vmatpush.msra.mxu3 %v51_v18  ;;  %v50_v19 = vld [vmem:[%s408_s3 + $0x70] sm:$0xff]  ;;  %v49_v20 = vld [vmem:[%s408_s3 + $0x68] sm:$0xff] }
   0x8   :  { %61 = vmatpush.msra.mxu0 %v32_v3  ;;  %147 = vmatpush.msra.mxu2 %v32_v3  ;;  %v48_v21 = vld [vmem:[%s408_s3 + $0x60] sm:$0xff]  ;;  %v47_v22 = vld [vmem:[%s408_s3 + $0x58] sm:$0xff]  ;;  %v46_v23 = vld [vmem:[%s408_s3 + $0x50] sm:$0xff] }
   0x9   :  { %102 = vmatpush.msra.mxu1 %v50_v19  ;;  %185 = vmatpush.msra.mxu3 %v50_v19  ;;  %v45_v24 = vld [vmem:[%s408_s3 + $0x48] sm:$0xff]  ;;  %v44_v25 = vld [vmem:[%s408_s3 + $0x40] sm:$0xff]  ;;  %v43_v26 = vld [vmem:[%s408_s3 + $0x38] sm:$0xff] }
   0xa   :  { %62 = vmatpush.msra.mxu0 %v31_v4  ;;  %148 = vmatpush.msra.mxu2 %v31_v4  ;;  %v42_v27 = vld [vmem:[%s408_s3 + $0x30] sm:$0xff]  ;;  %v41_v28 = vld [vmem:[%s408_s3 + $0x28] sm:$0xff]  ;;  %v40_v29 = vld [vmem:[%s408_s3 + $0x20] sm:$0xff] }
   0xb   :  { %103 = vmatpush.msra.mxu1 %v49_v20  ;;  %186 = vmatpush.msra.mxu3 %v49_v20  ;;  %v39_v30 = vld [vmem:[%s408_s3 + $0x18] sm:$0xff]  ;;  %v38_v31 = vld [vmem:[%s408_s3 + $0x10] sm:$0xff]  ;;  %v37_v32 = vld [vmem:[%s408_s3 + $0x8] sm:$0xff] }
   0xc   :  { %63 = vmatpush.msra.mxu0 %v30_v5  ;;  %149 = vmatpush.msra.mxu2 %v30_v5  ;;  %v234_v33 = vld [vmem:[%s405_s2] ss:$0 sm:$0xff] }
   0xd   :  { %104 = vmatpush.msra.mxu1 %v48_v21  ;;  %187 = vmatpush.msra.mxu3 %v48_v21  ;;  %v36_v34 = vld [vmem:[%s408_s3] sm:$0xff] }
   0xe   :  { %64 = vmatpush.msra.mxu0 %v29_v6  ;;  %150 = vmatpush.msra.mxu2 %v29_v6  ;;  %v235_v3 = vld [vmem:[%s407_s4] ss:$0 sm:$0xff] }
   0xf   :  { %105 = vmatpush.msra.mxu1 %v47_v22  ;;  %188 = vmatpush.msra.mxu3 %v47_v22 }
  0x10   :  { %65 = vmatpush.msra.mxu0 %v28_v7  ;;  %151 = vmatpush.msra.mxu2 %v28_v7 }
  0x11   :  { %106 = vmatpush.msra.mxu1 %v46_v23  ;;  %189 = vmatpush.msra.mxu3 %v46_v23 }
  0x12   :  { %66 = vmatpush.msra.mxu0 %v27_v8  ;;  %152 = vmatpush.msra.mxu2 %v27_v8 }
  0x13   :  { %107 = vmatpush.msra.mxu1 %v45_v24  ;;  %190 = vmatpush.msra.mxu3 %v45_v24 }
  0x14   :  { %67 = vmatpush.msra.mxu0 %v26_v9  ;;  %153 = vmatpush.msra.mxu2 %v26_v9 }
  0x15   :  { %108 = vmatpush.msra.mxu1 %v44_v25  ;;  %191 = vmatpush.msra.mxu3 %v44_v25 }
  0x16   :  { %68 = vmatpush.msra.mxu0 %v25_v10  ;;  %154 = vmatpush.msra.mxu2 %v25_v10 }
  0x17   :  { %109 = vmatpush.msra.mxu1 %v43_v26  ;;  %192 = vmatpush.msra.mxu3 %v43_v26 }
  0x18   :  { %69 = vmatpush.msra.mxu0 %v24_v11  ;;  %155 = vmatpush.msra.mxu2 %v24_v11 }
  0x19   :  { %110 = vmatpush.msra.mxu1 %v42_v27  ;;  %193 = vmatpush.msra.mxu3 %v42_v27 }
  0x1a   :  { %70 = vmatpush.msra.mxu0 %v23_v12  ;;  %156 = vmatpush.msra.mxu2 %v23_v12 }
  0x1b   :  { %111 = vmatpush.msra.mxu1 %v41_v28  ;;  %194 = vmatpush.msra.mxu3 %v41_v28 }
  0x1c   :  { %71 = vmatpush.msra.mxu0 %v22_v13  ;;  %157 = vmatpush.msra.mxu2 %v22_v13 }
  0x1d   :  { %112 = vmatpush.msra.mxu1 %v40_v29  ;;  %195 = vmatpush.msra.mxu3 %v40_v29 }
  0x1e   :  { %72 = vmatpush.msra.mxu0 %v21_v14  ;;  %158 = vmatpush.msra.mxu2 %v21_v14 }
  0x1f   :  { %113 = vmatpush.msra.mxu1 %v39_v30  ;;  %196 = vmatpush.msra.mxu3 %v39_v30 }
  0x20   :  { %73 = vmatpush.msra.mxu0 %v20_v15  ;;  %159 = vmatpush.msra.mxu2 %v20_v15 }
  0x21   :  { %74 = vmatmul.f32.vlgmr.msra.gmra.mxu0 %v333_v16  ;;  %160 = vmatmul.f32.vlgmr.msra.gmra.mxu2 %v338_v17 }
  0x22   :  { %114 = vmatpush.msra.mxu1 %v38_v31  ;;  %197 = vmatpush.msra.mxu3 %v38_v31 }
  0x24   :  { %115 = vmatpush.msra.mxu1 %v37_v32  ;;  %198 = vmatpush.msra.mxu3 %v37_v32 }
  0x26   :  { %116 = vmatpush.msra.mxu1 %v36_v34  ;;  %199 = vmatpush.msra.mxu3 %v36_v34 }
  0x9e   :  { %v75_v35 = vpop.f32.mrf.mxu0 }
  0x9f   :  { %v76_v36 = vadd.f32 %v234_v33, %v75_v35 }
  0xa1   :  { %v230_v37 = vmul.f32 -1.442695, %v76_v36 }
  0xa3   :  { %236 = vpow2.f32 %v230_v37 }
  0xa4   :  { %v161_v38 = vpop.f32.mrf.mxu2 }
  0xa5   :  { %v162_v39 = vadd.f32 %v234_v33, %v161_v38 }
  0xa7   :  { %v232_v40 = vmul.f32 -1.442695, %v162_v39 }
  0xa9   :  { %v237_v41 = vpop.eup %236  ;;  %238 = vpow2.f32 %v232_v40 }
  0xaa   :  { %v81_v42 = vadd.f32 1.0, %v237_v41 }
  0xac   :  { %240 = vrcp.f32 %v81_v42  ;;  %v93_v47 = vand.u32 2147483648, %v81_v42  ;;  %vm87_vm0 = vweird.f32 %v81_v42  ;;  %v91_v49 = vand.u32 2147483647, %v81_v42 }
  0xae   :  { %v94_v52 = vor.u32 1.1754944e-38, %v93_v47  ;;  %vm92_vm3 = vcmp.eq.f32.partialorder %v91_v49, 8.507059e+37 }
  0xaf   :  { %v239_v43 = vpop.eup %238 }
  0xb0   :  { %v167_v44 = vadd.f32 1.0, %v239_v43 }
  0xb2   :  { %v241_v45 = vpop.eup %240  ;;  %242 = vrcp.f32 %v167_v44  ;;  %v179_v58 = vand.u32 2147483648, %v167_v44  ;;  %v177_v61 = vand.u32 2147483647, %v167_v44  ;;  %vm173_vm5 = vweird.f32 %v167_v44 }
  0xb3   :  { %v83_v46 = vmul.f32 %v241_v45, %v81_v42  ;;  %vm88_vm1 = vweird.f32 %v241_v45 }
  0xb4   :  { %vm89_vm2 = vmor %vm87_vm0, %vm88_vm1  ;;  %v180_v63 = vor.u32 1.1754944e-38, %v179_v58  ;;  %vm178_vm7 = vcmp.eq.f32.partialorder %v177_v61, 8.507059e+37 }
  0xb5   :  { %v84_v48 = vsub.f32 1.0, %v83_v46 }
  0xb7   :  { %v85_v50 = vmul.f32 %v241_v45, %v84_v48 }
  0xb8   :  { %v243_v51 = vpop.eup %242 }
  0xb9   :  { %v86_v53 = vadd.f32 %v241_v45, %v85_v50  ;;  %v169_v54 = vmul.f32 %v243_v51, %v167_v44  ;;  %vm174_vm4 = vweird.f32 %v243_v51 }
  0xba   :  { %vm175_vm6 = vmor %vm173_vm5, %vm174_vm4 }
  0xbb   :  { %v90_v55 = vsel %vm89_vm2, %v241_v45, %v86_v53  ;;  %v170_v56 = vsub.f32 1.0, %v169_v54 }
  0xbc   :  { %v95_v57 = vsel %vm92_vm3, %v94_v52, %v90_v55 }
  0xbd   :  { %v97_v59 = vmul.f32 %v95_v57, %v76_v36  ;;  %v171_v60 = vmul.f32 %v243_v51, %v170_v56 }
  0xbf   :  { %117 = vmatmul.f32.vlgmr.msra.gmra.mxu1 %v97_v59  ;;  %v172_v62 = vadd.f32 %v243_v51, %v171_v60 }
  0xc1   :  { %v176_v0 = vsel %vm175_vm6, %v243_v51, %v172_v62 }
  0xc2   :  { %v181_v1 = vsel %vm178_vm7, %v180_v63, %v176_v0 }
  0xc3   :  { %v183_v2 = vmul.f32 %v181_v1, %v162_v39 }
  0xc5   :  { %200 = vmatmul.f32.vlgmr.msra.gmra.mxu3 %v183_v2 }
 0x13c   :  { %v118_v4 = vpop.f32.mrf.mxu1 }
 0x13d   :  { %v119_v5 = vadd.f32 %v235_v3, %v118_v4 }
 0x13f   :  { %v231_v6 = vmul.f32 -1.442695, %v119_v5 }
 0x141   :  { %244 = vpow2.f32 %v231_v6 }
 0x147   :  { %v245_v7 = vpop.eup %244 }
 0x148   :  { %v124_v8 = vadd.f32 1.0, %v245_v7  ;;  %v201_v9 = vpop.f32.mrf.mxu3 }
 0x149   :  { %v202_v10 = vadd.f32 %v235_v3, %v201_v9 }
 0x14a   :  { %246 = vrcp.f32 %v124_v8  ;;  %v136_v18 = vand.u32 2147483648, %v124_v8  ;;  %v134_v21 = vand.u32 2147483647, %v124_v8  ;;  %vm130_vm9 = vweird.f32 %v124_v8 }
 0x14b   :  { %v233_v11 = vmul.f32 -1.442695, %v202_v10 }
 0x14c   :  { %v137_v23 = vor.u32 1.1754944e-38, %v136_v18  ;;  %vm135_vm11 = vcmp.eq.f32.partialorder %v134_v21, 8.507059e+37 }
 0x14d   :  { %248 = vpow2.f32 %v233_v11 }
 0x150   :  { %v247_v12 = vpop.eup %246 }
 0x151   :  { %v126_v13 = vmul.f32 %v247_v12, %v124_v8  ;;  %vm131_vm8 = vweird.f32 %v247_v12 }
 0x152   :  { %vm132_vm10 = vmor %vm130_vm9, %vm131_vm8 }
 0x153   :  { %v249_v14 = vpop.eup %248  ;;  %v127_v15 = vsub.f32 1.0, %v126_v13 }
 0x154   :  { %v207_v19 = vadd.f32 1.0, %v249_v14 }
 0x155   :  { %v128_v20 = vmul.f32 %v247_v12, %v127_v15 }
 0x156   :  { %250 = vrcp.f32 %v207_v19  ;;  %v219_v31 = vand.u32 2147483648, %v207_v19  ;;  %v217_v33 = vand.u32 2147483647, %v207_v19  ;;  %vm213_vm13 = vweird.f32 %v207_v19 }
 0x157   :  { %v129_v22 = vadd.f32 %v247_v12, %v128_v20 }
 0x158   :  { %v220_v35 = vor.u32 1.1754944e-38, %v219_v31  ;;  %vm218_vm15 = vcmp.eq.f32.partialorder %v217_v33, 8.507059e+37 }
 0x159   :  { %v133_v24 = vsel %vm132_vm10, %v247_v12, %v129_v22 }
 0x15a   :  { %v138_v25 = vsel %vm135_vm11, %v137_v23, %v133_v24 }
 0x15b   :  { %v140_v26 = vmul.f32 %v138_v25, %v119_v5 }
 0x15c   :  { %v251_v27 = vpop.eup %250 }
 0x15d   :  { %v141_v28 = vadd.f32 %v140_v26, %v333_v16  ;;  %v209_v29 = vmul.f32 %v251_v27, %v207_v19  ;;  %vm214_vm12 = vweird.f32 %v251_v27 }
 0x15e   :  { %vm215_vm14 = vmor %vm213_vm13, %vm214_vm12 }
 0x15f   :  { %142 = vst [vmem:[%s409_s5] sm:$0xff] %v141_v28  ;;  %v210_v30 = vsub.f32 1.0, %v209_v29 }
 0x161   :  { %v211_v32 = vmul.f32 %v251_v27, %v210_v30 }
 0x163   :  { %v212_v34 = vadd.f32 %v251_v27, %v211_v32 }
 0x165   :  { %v216_v36 = vsel %vm215_vm14, %v251_v27, %v212_v34 }
 0x166   :  { %v221_v37 = vsel %vm218_vm15, %v220_v35, %v216_v36 }
 0x167   :  { %v223_v38 = vmul.f32 %v221_v37, %v202_v10 }
 0x169   :  { %v224_v16 = vadd.f32 %v223_v38, %v338_v17 }
 0x16b   :  { %225 = vst [vmem:[%s409_s5 + $0x8] sm:$0xff] %v224_v16 }

</bundles_post_ra>
